<compile_context>
chip_gen: v6e
topology: v6e:2x2x1
jax: 0.10.0
libtpu: 0.0.40
codegen_flags: <defaults>
</compile_context>

<pallas_src>
import numpy as np
import jax
import jax.numpy as jnp
from jax.experimental import pallas as pl
from jax.experimental.pallas import tpu as pltpu


def _round_up(x: int, m: int) -> int:
    return ((x + m - 1) // m) * m


# --------------------------- parameter setup (glue, matches __init__) --------

def make_A(N: int) -> np.ndarray:
    def v(n, k):
        if n > k:
            return np.sqrt(2 * n + 1) * np.sqrt(2 * k + 1)
        elif n == k:
            return float(n + 1)
        return 0.0
    return -np.array([[v(n, k) for k in range(1, N + 1)] for n in range(1, N + 1)],
                     dtype=np.float64)


def discretize(A, B, C, step):
    I = np.eye(A.shape[0])
    BL = np.linalg.inv(I - step / 2.0 * A)
    Ab = BL @ (I + step / 2.0 * A)
    Bb = (BL * step) @ B
    return Ab, Bb, C


def compute_kernel(Ab, Bb, Cb, L):
    return np.array([(Cb @ np.linalg.matrix_power(Ab, l) @ Bb).item()
                     for l in range(L)], dtype=np.float64)


def build_s4_params(d_state: int, L: int, seed: int = 0):
    rng = np.random.default_rng(seed)          # deterministic synthetic params
    A = make_A(d_state)
    B = rng.standard_normal((d_state, 1))
    C = rng.standard_normal((1, d_state))
    Ab, Bb, Cb = discretize(A, B, C, step=1.0 / L)
    K = compute_kernel(Ab, Bb, Cb, L)
    return (jnp.asarray(Ab, jnp.float32), jnp.asarray(Bb, jnp.float32),
            jnp.asarray(Cb, jnp.float32), jnp.asarray(K, jnp.float32))


# --------------------- cached-at-init operators (like self.K) ----------------

def prepare_kernel_op(K, L, *, lane_tile=1024):
    """Toeplitz matrix + triangular tile tables, built ONCE at init."""
    lt = min(lane_tile, _round_up(L, 128))
    L_pad = _round_up(L, lt)
    nj = L_pad // lt
    K_np = np.zeros(L_pad, np.float64)
    K_np[:L] = np.asarray(K, np.float64)
    idx = np.arange(L_pad)
    diff = idx[None, :] - idx[:, None]                 # col - row
    M = np.where(diff >= 0, K_np[np.clip(diff, 0, L_pad - 1)], 0.0)  # upper-tri Toeplitz
    # Only the k <= j tile pairs of M are nonzero; enumerate them (j outer,
    # k inner ascending) so each output tile's last contribution is k == j.
    pairs = [(k, j) for j in range(nj) for k in range(j + 1)]
    k_tbl = jnp.asarray([p[0] for p in pairs], jnp.int32)
    j_tbl = jnp.asarray([p[1] for p in pairs], jnp.int32)
    return dict(M=jnp.asarray(M, jnp.bfloat16), L=L, L_pad=L_pad, lt=lt,
                k_tbl=k_tbl, j_tbl=j_tbl)


def _default_time_chunk():
    # v6e/v7x MXUs are 256x256 -> T=256 fills the array; v5e's is 128x128.
    try:
        kind = jax.devices()[0].device_kind.lower()
    except Exception:
        return 128
    return 128 if "v5" in kind else 256


def prepare_regressive_op(A_, B_, C_, L, *, time_chunk=None):
    """Chunked block-recurrence matrices for the native (B, L, D) layout.

    Host-side numpy (f64) from the f32 module parameters, built ONCE at init
    (same spirit as compute_kernel() in the PyTorch module's __init__).
    """
    T = time_chunk if time_chunk is not None else _default_time_chunk()
    T = min(T, _round_up(L, 128))                      # lane-/sublane-aligned
    L_pad = _round_up(L, T)
    A = np.asarray(A_, np.float64)
    B = np.asarray(B_, np.float64)
    C = np.asarray(C_, np.float64)
    N = A.shape[0]
    N_pad = _round_up(N, 8)
    pows = [np.eye(N)]
    for _ in range(T):
        pows.append(pows[-1] @ A)                      # pows[j] = A^j
    K = np.array([(C @ pows[l] @ B).item() for l in range(T)])
    idx = np.arange(T)
    diff = idx[:, None] - idx[None, :]                 # out time - in time
    MblkT = np.where(diff >= 0, K[np.clip(diff, 0, T - 1)], 0.0)         # (T, T)
    GT = np.stack([(C @ pows[j + 1]).ravel() for j in range(T)], 0)      # (T, N)
    PT = pows[T]                                                          # (N, N)
    WT = np.stack([(pows[T - 1 - i] @ B).ravel() for i in range(T)], 1)   # (N, T)
    GTp = np.zeros((T, N_pad));       GTp[:, :N] = GT
    PTp = np.zeros((N_pad, N_pad));   PTp[:N, :N] = PT
    WTp = np.zeros((N_pad, T));       WTp[:N, :] = WT
    return dict(T=T, L=L, L_pad=L_pad, N_pad=N_pad,
                MblkT=jnp.asarray(MblkT, jnp.bfloat16),
                GT=jnp.asarray(GTp, jnp.float32),
                PT=jnp.asarray(PTp, jnp.float32),
                WT=jnp.asarray(WTp, jnp.float32))


# --------------------------------- Pallas kernels ----------------------------

def _toeplitz_tri_matmul_kernel(k_tbl_ref, j_tbl_ref, u_ref, m_ref, y_ref, acc_ref):
    # Tiled y_flat = u_flat @ M, visiting only the nonzero (k <= j) M tiles
    # enumerated by the scalar-prefetch tables.  bf16 operands, f32 accum.
    f = pl.program_id(1)
    k = k_tbl_ref[f]
    j = j_tbl_ref[f]

    @pl.when(k == 0)                                   # first contribution to tile j
    def _():
        acc_ref[...] = jnp.zeros_like(acc_ref)

    acc_ref[...] += jnp.dot(u_ref[...], m_ref[...],
                            preferred_element_type=jnp.float32)

    @pl.when(k == j)                                   # last contribution to tile j
    def _():
        y_ref[...] = acc_ref[...]


def _s4_chunk_recurrence_kernel(u_ref, mT_ref, gT_ref, pT_ref, wT_ref, y_ref, x_ref):
    # One time chunk of the linear recurrence, native (L, D) layout:
    #   y_chunk = MblkT @ u_chunk + GT @ x_prev
    #   x_next  = PT    @ x_prev  + WT @ u_chunk
    # State x (N_pad, D) lives in VMEM scratch across the serial chunk axis.
    @pl.when(pl.program_id(1) == 0)
    def _():
        x_ref[...] = jnp.zeros_like(x_ref)

    u_bf = u_ref[0]                                    # (T, D) bf16
    x_prev = x_ref[...]                                # (N_pad, D) f32
    y_ref[0] = (jnp.dot(mT_ref[...], u_bf, preferred_element_type=jnp.float32)
                + jnp.dot(gT_ref[...], x_prev, preferred_element_type=jnp.float32))
    x_ref[...] = (jnp.dot(pT_ref[...], x_prev, preferred_element_type=jnp.float32)
                  + jnp.dot(wT_ref[...], u_bf.astype(jnp.float32),
                            preferred_element_type=jnp.float32))


# --------------------------------- wrappers ----------------------------------

def s4_forward_kernel_method(u, kern_op, *, row_tile=1024):
    """u: (B, L, D) -> y: (B, L, D); FFT-conv path as a triangular Toeplitz matmul."""
    Bsz, L, D = u.shape
    assert L == kern_op["L"]
    BD = Bsz * D
    L_pad, lt = kern_op["L_pad"], kern_op["lt"]
    M, k_tbl, j_tbl = kern_op["M"], kern_op["k_tbl"], kern_op["j_tbl"]

    # torch does u.view(B*D, L) on a contiguous (B, L, D) tensor: raw reshape,
    # no permute (intentional parity with the PyTorch layout).
    u_flat = u.reshape(BD, L)
    tm = min(row_tile, _round_up(BD, 8))
    BD_pad = _round_up(BD, tm)
    u_p = jnp.pad(u_flat, ((0, BD_pad - BD), (0, L_pad - L))).astype(jnp.bfloat16)

    F = int(k_tbl.shape[0])                            # number of nonzero M tiles
    grid = (BD_pad // tm, F)
    flops = 2 * BD_pad * lt * lt * F                   # lower-triangular count
    bytes_accessed = ((BD_pad // tm) * F * (tm * lt + lt * lt) * 2
                      + BD_pad * L_pad * 4)

    y_p = pl.pallas_call(
        _toeplitz_tri_matmul_kernel,
        out_shape=jax.ShapeDtypeStruct((BD_pad, L_pad), jnp.float32),
        grid_spec=pltpu.PrefetchScalarGridSpec(
            num_scalar_prefetch=2, grid=grid,
            in_specs=[pl.BlockSpec((tm, lt), lambda i, f, kt, jt: (i, kt[f])),
                      pl.BlockSpec((lt, lt), lambda i, f, kt, jt: (kt[f], jt[f]))],
            out_specs=pl.BlockSpec((tm, lt), lambda i, f, kt, jt: (i, jt[f])),
            scratch_shapes=[pltpu.VMEM((tm, lt), jnp.float32)]),
        compiler_params=pltpu.CompilerParams(
            dimension_semantics=("parallel", "arbitrary"),
            vmem_limit_bytes=48 * 1024 * 1024),        # fits v7x's 64 MiB VMEM
        cost_estimate=pl.CostEstimate(flops=flops, transcendentals=0,
                                      bytes_accessed=bytes_accessed),
    )(k_tbl, j_tbl, u_p, M)

    y_flat = y_p[:BD, :L]
    # TODO(synk): this trailing permute cannot be folded into out_specs without
    # width-D (non-lane-dense) stores, because the torch .view(B*D, L) parity
    # interleaves the L and D axes; keep it as one XLA transpose.
    return y_flat.reshape(Bsz, D, L).transpose(0, 2, 1)


def s4_forward_regressive(u, reg_op):
    """u: (B, L, D) -> y: (B, L, D); recurrent path, native layout (no transposes)."""
    Bsz, L, D = u.shape
    assert L == reg_op["L"]
    T, L_pad, N_pad = reg_op["T"], reg_op["L_pad"], reg_op["N_pad"]

    # bf16 feed halves the dominant HBM read stream; state path stays f32.
    u_p = jnp.pad(u, ((0, 0), (0, L_pad - L), (0, 0))).astype(jnp.bfloat16)

    n_chunks = L_pad // T
    flops = 2 * Bsz * n_chunks * (T * T + 2 * T * N_pad + N_pad * N_pad) * D
    bytes_accessed = (Bsz * L_pad * D * (2 + 4)
                      + T * T * 2 + (2 * T * N_pad + N_pad * N_pad) * 4)

    y_p = pl.pallas_call(
        _s4_chunk_recurrence_kernel,
        out_shape=jax.ShapeDtypeStruct((Bsz, L_pad, D), jnp.float32),
        grid_spec=pltpu.PrefetchScalarGridSpec(
            num_scalar_prefetch=0, grid=(Bsz, n_chunks),  # B >= 2 parallel tiles
            in_specs=[pl.BlockSpec((1, T, D), lambda b, c: (b, c, 0)),
                      pl.BlockSpec((T, T), lambda b, c: (0, 0)),
                      pl.BlockSpec((T, N_pad), lambda b, c: (0, 0)),
                      pl.BlockSpec((N_pad, N_pad), lambda b, c: (0, 0)),
                      pl.BlockSpec((N_pad, T), lambda b, c: (0, 0))],
            out_specs=pl.BlockSpec((1, T, D), lambda b, c: (b, c, 0)),
            scratch_shapes=[pltpu.VMEM((N_pad, D), jnp.float32)]),
        compiler_params=pltpu.CompilerParams(
            dimension_semantics=("parallel", "arbitrary"),
            vmem_limit_bytes=32 * 1024 * 1024),
        cost_estimate=pl.CostEstimate(flops=flops, transcendentals=0,
                                      bytes_accessed=bytes_accessed),
    )(u_p, reg_op["MblkT"], reg_op["GT"], reg_op["PT"], reg_op["WT"])

    return y_p[:, :L, :]


# --------------------------------- references --------------------------------

def ref_kernel_method(u_np, K_np):
    Bsz, L, D = u_np.shape
    u_flat = u_np.reshape(Bsz * D, L)
    u_padded = np.pad(u_flat, ((0, 0), (0, K_np.shape[0])))
    u_fft = np.fft.rfft(u_padded)
    K_padded = np.pad(K_np, (0, u_padded.shape[1] - K_np.shape[0]))  # intended pad
    K_fft = np.fft.rfft(K_padded)
    y = np.fft.irfft(u_fft * K_fft)[:, :L]
    return y.reshape(Bsz, D, L).transpose(0, 2, 1)


def ref_regressive(u_np, A, Bm, C):
    Bsz, L, D = u_np.shape
    u_flat = np.transpose(u_np, (0, 2, 1)).reshape(Bsz * D, L)
    x = np.zeros((Bsz * D, A.shape[0]))
    ys = np.zeros((Bsz * D, L))
    for k in range(L):
        x = x @ A.T + u_flat[:, k:k + 1] @ Bm.T
        ys[:, k] = (x @ C.T)[:, 0]
    return ys.reshape(Bsz, D, L).transpose(0, 2, 1)


# ----------------------------------- main ------------------------------------

if __name__ == "__main__":
    batch, L, d_model, d_state = 2, 16, 4, 8

    A_, B_, C_, K = build_s4_params(d_state, L, seed=0)

    # Cache the operator matrices at init (like self.K in the PyTorch module).
    kern_op = prepare_kernel_op(K, L, lane_tile=1024)
    reg_op = prepare_regressive_op(A_, B_, C_, L)

    key = jax.random.PRNGKey(0)
    u = jax.random.normal(key, (batch, L, d_model), dtype=jnp.float32)

    # kernel_method=True path
    y_kern = jax.block_until_ready(s4_forward_kernel_method(u, kern_op))
    # kernel_method=False path
    y_reg = jax.block_until_ready(s4_forward_regressive(u, reg_op))

    u_np = np.asarray(u, dtype=np.float64)
    y_kern_ref = ref_kernel_method(u_np, np.asarray(K, np.float64))
    y_reg_ref = ref_regressive(u_np, np.asarray(A_, np.float64),
                               np.asarray(B_, np.float64), np.asarray(C_, np.float64))

    # Both paths use bf16 MXU operands with f32 accumulation -> loose tolerance.
    np.testing.assert_allclose(np.asarray(y_kern), y_kern_ref, rtol=2e-2, atol=2e-2)
    np.testing.assert_allclose(np.asarray(y_reg), y_reg_ref, rtol=2e-2, atol=2e-2)

    print("KERNEL_OK")
</pallas_src>

<mosaic_0001>
module attributes {stable_mosaic.version = 11 : i64} {
  func.func @_toeplitz_tri_matmul_kernel(%arg0: i32, %arg1: i32, %arg2: memref<1xi32, #tpu.memory_space<smem>>, %arg3: memref<1xi32, #tpu.memory_space<smem>>, %arg4: memref<8x128xbf16, #tpu.memory_space<vmem>>, %arg5: memref<128x128xbf16, #tpu.memory_space<vmem>>, %arg6: memref<8x128xf32, #tpu.memory_space<vmem>>, %arg7: memref<8x128xf32, #tpu.memory_space<vmem>>) attributes {dimension_semantics = [#tpu.dimension_semantics<parallel>, #tpu.dimension_semantics<arbitrary>], iteration_bounds = array<i64: 1, 1>, scalar_prefetch = 2 : i64, scratch_operands = 1 : i64, tpu.core_type = #tpu.core_type<tc>, window_params = [{transform_indices = @transform_0, window_bounds = array<i64: 8, 128>}, {transform_indices = @transform_1, window_bounds = array<i64: 128, 128>}, {transform_indices = @transform_2, window_bounds = array<i64: 8, 128>}]} {
    %0 = arith.index_cast %arg1 : i32 to index
    %1 = memref.load %arg2[%0] : memref<1xi32, #tpu.memory_space<smem>>
    %2 = arith.index_cast %arg1 : i32 to index
    %3 = memref.load %arg3[%2] : memref<1xi32, #tpu.memory_space<smem>>
    %c0_i32 = arith.constant 0 : i32
    %4 = arith.cmpi eq, %1, %c0_i32 : i32
    %5 = arith.extui %4 : i1 to i32
    %c0_i32_0 = arith.constant 0 : i32
    %6 = arith.cmpi ne, %5, %c0_i32_0 : i32
    scf.if %6 {
      %cst_9 = arith.constant 0.000000e+00 : f32
      %16 = vector.broadcast %cst_9 : f32 to vector<8x128xf32>
      %c0_10 = arith.constant 0 : index
      %c0_11 = arith.constant 0 : index
      %17 = vector.load %arg7[%c0_10, %c0_11] : memref<8x128xf32, #tpu.memory_space<vmem>>, vector<8x128xf32>
      tpu.vector_store %arg7[%c0_10, %c0_11], %16 {strides = array<i32>} : memref<8x128xf32, #tpu.memory_space<vmem>>, vector<8x128xf32>,
    } else {
    }
    %c0 = arith.constant 0 : index
    %c0_1 = arith.constant 0 : index
    %7 = vector.load %arg7[%c0, %c0_1] : memref<8x128xf32, #tpu.memory_space<vmem>>, vector<8x128xf32>
    %c0_2 = arith.constant 0 : index
    %c0_3 = arith.constant 0 : index
    %8 = vector.load %arg4[%c0_2, %c0_3] : memref<8x128xbf16, #tpu.memory_space<vmem>>, vector<8x128xbf16>
    %c0_4 = arith.constant 0 : index
    %c0_5 = arith.constant 0 : index
    %9 = vector.load %arg5[%c0_4, %c0_5] : memref<128x128xbf16, #tpu.memory_space<vmem>>, vector<128x128xbf16>
    %cst = arith.constant dense<0.000000e+00> : vector<8x128xf32>
    %10 = tpu.matmul %8, %9, %cst {dimension_numbers = #tpu.dot_dimension_numbers<[1], [0], [0], [1], [0, 0, 1, 1], [], []>} : vector<8x128xbf16>, vector<128x128xbf16>, vector<8x128xf32> -> vector<8x128xf32>
    %11 = arith.addf %7, %10 : vector<8x128xf32>
    %c0_6 = arith.constant 0 : index
    %c0_7 = arith.constant 0 : index
    %12 = vector.load %arg7[%c0_6, %c0_7] : memref<8x128xf32, #tpu.memory_space<vmem>>, vector<8x128xf32>
    tpu.vector_store %arg7[%c0_6, %c0_7], %11 {strides = array<i32>} : memref<8x128xf32, #tpu.memory_space<vmem>>, vector<8x128xf32>,
    %13 = arith.cmpi eq, %1, %3 : i32
    %14 = arith.extui %13 : i1 to i32
    %c0_i32_8 = arith.constant 0 : i32
    %15 = arith.cmpi ne, %14, %c0_i32_8 : i32
    scf.if %15 {
      %c0_9 = arith.constant 0 : index
      %c0_10 = arith.constant 0 : index
      %16 = vector.load %arg7[%c0_9, %c0_10] : memref<8x128xf32, #tpu.memory_space<vmem>>, vector<8x128xf32>
      %c0_11 = arith.constant 0 : index
      %c0_12 = arith.constant 0 : index
      %17 = vector.load %arg6[%c0_11, %c0_12] : memref<8x128xf32, #tpu.memory_space<vmem>>, vector<8x128xf32>
      tpu.vector_store %arg6[%c0_11, %c0_12], %16 {strides = array<i32>} : memref<8x128xf32, #tpu.memory_space<vmem>>, vector<8x128xf32>,
    } else {
    }
    return
  }
  func.func @transform_0(%arg0: i32, %arg1: i32, %arg2: memref<1xi32, #tpu.memory_space<smem>>, %arg3: memref<1xi32, #tpu.memory_space<smem>>) -> (i32, i32) {
    %0 = arith.index_cast %arg1 : i32 to index
    %1 = memref.load %arg2[%0] : memref<1xi32, #tpu.memory_space<smem>>
    %c0_i32 = arith.constant 0 : i32
    return %arg0, %1 : i32, i32
  }
  func.func @transform_1(%arg0: i32, %arg1: i32, %arg2: memref<1xi32, #tpu.memory_space<smem>>, %arg3: memref<1xi32, #tpu.memory_space<smem>>) -> (i32, i32) {
    %0 = arith.index_cast %arg1 : i32 to index
    %1 = memref.load %arg2[%0] : memref<1xi32, #tpu.memory_space<smem>>
    %2 = arith.index_cast %arg1 : i32 to index
    %3 = memref.load %arg3[%2] : memref<1xi32, #tpu.memory_space<smem>>
    %c0_i32 = arith.constant 0 : i32
    return %1, %3 : i32, i32
  }
  func.func @transform_2(%arg0: i32, %arg1: i32, %arg2: memref<1xi32, #tpu.memory_space<smem>>, %arg3: memref<1xi32, #tpu.memory_space<smem>>) -> (i32, i32) {
    %0 = arith.index_cast %arg1 : i32 to index
    %1 = memref.load %arg3[%0] : memref<1xi32, #tpu.memory_space<smem>>
    %c0_i32 = arith.constant 0 : i32
    return %arg0, %1 : i32, i32
  }
}

</mosaic_0001>

<bundles_post_ra>
// kernel: tpu_custom_call.1
= control target key start
LH: loop header
LB: loop body
LE: loop exit
PB: predicated region body
PF: predicated region fallthrough
CT: control target
= control target key end

     0   :  { %s392_s0 = inlined_call_operand.<no memory space> [shape: s32[1], index: 0, kind: input, shape index: {}]   ;;  %s393_s1 = inlined_call_operand.<no memory space> [shape: s32[1], index: 1, kind: input, shape index: {}]   ;;  %s394_s2 = inlined_call_operand.vmem [shape: bf16[8,128], index: 2, kind: input, shape index: {}]   ;;  %s395_s3 = inlined_call_operand.hbm [shape: bf16[128,128], index: 3, kind: input, shape index: {}]   ;;  %s396_s4 = inlined_call_operand.hbm [shape: f32[8,128], index: 4, kind: output, shape index: {}]  }
   0x1   :  { %10 = sst [smem:[#allocation5]] %s393_s1 }
   0x2   :  { %11 = vsyncpa [#allocation7], 0 }
   0x3   :  { %12 = vsyncpa [#allocation8], 0  ;;  %s24_s17 = sld [smem:[#allocation5]]  ;;  %s209_s20 = sshll.u32 %s392_s0, 4 }
   0x4   :  { %s315_s21 = smov [#allocation6]   ;;  %s269_s30 = scalar_lea.hbm %s395_s3, 1024 }
   0x5   :  { %s32_s22 = sshll.u32 %s315_s21, 4  ;;  %s33_s22 = int_to_ptr.vmem [resolvable:$true] %s32_s22 }
   0x9   :  { %s29_s23 = sadd.s32 %s209_s20, %s24_s17 }
   0xa   :  { %s210_s24 = sshll.u32 %s29_s23, 6 }
   0xb   :  { %s31_s27 = scalar_lea.hbm %s395_s3, %s210_s24 }
   0xc   :  { %s267_s28 = scalar_lea.hbm %s31_s27, 1024  ;;  %p270_p1 = scmp.lt.s32.totalorder %s31_s27, %s395_s3 }
   0xd   :  { %p268_p0 = scmp.ne.s32.totalorder %s31_s27, %s267_s28  ;;  %p271_p2 = scmp.lt.s32.totalorder %s269_s30, %s267_s28 }
   0xf   :  { %p272_p3 = por %p271_p2, %p270_p1 }
  0x11   :  { %p273_p4 = pnand %p272_p3, %p268_p0 }
  0x13   :  { %276 = shalt.err (!%p273_p4)
}
  0x14   :  { %s277_s7 = scalar_lea.vmem %s33_s22, 1024  ;;  %p282_p6 = scmp.lt.s32.totalorder %s33_s22, %s33_s22 }
  0x15   :  { %p278_p5 = scmp.ne.s32.totalorder %s33_s22, %s277_s7  ;;  %p283_p7 = scmp.lt.s32.totalorder %s277_s7, %s277_s7 }
  0x17   :  { %p284_p8 = por %p283_p7, %p282_p6 }
  0x19   :  { %p285_p9 = pnand %p284_p8, %p278_p5 }
  0x1b   :  { %288 = shalt.err (!%p285_p9)
}
  0x1c   :  { %s316_s8 = smov 64   ;;  %s317_s9 = smov 4  }
  0x1d   :  { %38 = dma.hbm_to_vmem [thread:$0]  %s31_s27, 1024, %s33_s22, [#allocation7], %s316_s8, %s316_s8, %s317_s9  }
  0x1e   :  { %311 = dma.done.wait [#allocation7], 1024  }
  0x1f   :  { %312 = vsyncadd [#allocation7], 4294966272  ;;  %p48_p10 = scmp.lt.s32.totalorder %s392_s0, 0  ;;  %s365_s3 = sld [smem:[#allocation5]] }
  0x20   :  { %p212_p11 = scmp.ne.s32.totalorder %s392_s0, 0 }
  0x21   :  { %s49_s14 = scalar_select %p48_p10, %s392_s0, 0 }
  0x22   :  { %63 = sbr.rel (%p212_p11) target bundleno = 41 (0x29), region = 17 }
  0x23   :  { %s211_s15 = sshll.u32 %s49_s14, 2 }
  0x24   :  { %s373_s18 = scalar_lea.vmem %s394_s2, %s211_s15 }
  0x27   :  { %v318_v0 = vmov 0.0  }
  0x28   :  { %64 = vst [vmem:[#allocation2] sm:$0xff] %v318_v0 }
  0x29 PF:  { %v259_v1 = vld [vmem:[#allocation6 + $0x38] sm:$0xff]   ;;  %v319_v2 = vmov 0.0   ;;  %v260_v3 = vld [vmem:[#allocation6 + $0x30] sm:$0xff]   ;;  %vm320_vm0 = vmmov 0   ;;  %v261_v4 = vld [vmem:[#allocation6 + $0x28] sm:$0xff]   ;;  %p221_p12 = scmp.ne.s32.totalorder %s392_s0, %s365_s3 }
  0x2a   :  { %232 = vmatprep.subr.bf16.mxu0 %v319_v2  ;;  %248 = vmatprep.mubr.msk.bf16.mxu0 %vm320_vm0, %v319_v2  ;;  %v262_v5 = vld [vmem:[#allocation6 + $0x20] sm:$0xff]   ;;  %v263_v6 = vld [vmem:[#allocation6 + $0x18] sm:$0xff]   ;;  %v264_v7 = vld [vmem:[#allocation6 + $0x10] sm:$0xff]  }
  0x2b   :  { %233 = vmatpush3.bf16.msra.mxu0 %v259_v1  ;;  %v265_v8 = vld [vmem:[#allocation6 + $0x8] sm:$0xff]   ;;  %v266_v9 = vld [vmem:[#allocation6] sm:$0xff]   ;;  %v66_v10 = vld [vmem:[%s373_s18] sm:$0xf] }
  0x2c   :  { %234 = vmatprep.subr.bf16.mxu0 %v319_v2 }
  0x2f   :  { %235 = vmatpush3.bf16.msra.mxu0 %v260_v3  ;;  %v65_v11 = vld [vmem:[#allocation2] sm:$0xff] }
  0x30   :  { %236 = vmatprep.subr.bf16.mxu0 %v319_v2 }
  0x33   :  { %237 = vmatpush3.bf16.msra.mxu0 %v261_v4 }
  0x34   :  { %238 = vmatprep.subr.bf16.mxu0 %v319_v2 }
  0x37   :  { %239 = vmatpush3.bf16.msra.mxu0 %v262_v5 }
  0x38   :  { %240 = vmatprep.subr.bf16.mxu0 %v319_v2 }
  0x3b   :  { %241 = vmatpush3.bf16.msra.mxu0 %v263_v6 }
  0x3c   :  { %242 = vmatprep.subr.bf16.mxu0 %v319_v2 }
  0x3f   :  { %243 = vmatpush3.bf16.msra.mxu0 %v264_v7 }
  0x40   :  { %244 = vmatprep.subr.bf16.mxu0 %v319_v2 }
  0x43   :  { %245 = vmatpush3.bf16.msra.mxu0 %v265_v8 }
  0x44   :  { %246 = vmatprep.subr.bf16.mxu0 %v319_v2 }
  0x47   :  { %247 = vmatpush3.bf16.msra.mxu0 %v266_v9 }
  0x4a   :  { %249 = vmatmul.mubr.bf16.vlgmr.msra.gmra.mxu0 %v66_v10 }
 0x10a   :  { %v165_v12 = vpop.f32.mrf.mxu0 }
 0x10b   :  { %v171_v13 = vadd.f32 %v165_v12, %v65_v11 }
 0x10c   :  { %v250_v14 = vpop.f32.mrf.mxu0  ;;  %176 = sbr.rel (%p221_p12) target bundleno = 278 (0x116), region = 21 }
 0x10d   :  { %172 = vst [vmem:[#allocation2] sm:$0xff] %v171_v13 }
 0x10e   :  { %v168_v15 = vpop.f32.mrf.mxu0 }
 0x110   :  { %v251_v16 = vpop.f32.mrf.mxu0 }
 0x114   :  { %v177_v17 = vld [vmem:[#allocation2] sm:$0xff] }
 0x115   :  { %178 = vst [vmem:[#allocation9] sm:$0xff] %v177_v17 }
 0x116 PF:  { %s181_s22 = sld [smem:[#allocation5]]  ;;  %s321_s23 = smov [#allocation9]  }
 0x117   :  { %s188_s24 = sshll.u32 %s321_s23, 4  ;;  %s189_s24 = int_to_ptr.vmem [resolvable:$true] %s188_s24 }
 0x118   :  { %s289_s29 = scalar_lea.vmem %s189_s24, 128  ;;  %p294_p0 = scmp.lt.s32.totalorder %s189_s24, %s189_s24 }
 0x119   :  { %p290_p13 = scmp.ne.s32.totalorder %s189_s24, %s289_s29  ;;  %p295_p1 = scmp.lt.s32.totalorder %s289_s29, %s289_s29 }
 0x11b   :  { %p296_p2 = por %p295_p1, %p294_p0 }
 0x11c   :  { %s222_s25 = sshll.u32 %s181_s22, 7 }
 0x11d   :  { %s186_s28 = scalar_lea.hbm %s396_s4, %s222_s25  ;;  %p297_p3 = pnand %p296_p2, %p290_p13 }
 0x11f   :  { %300 = shalt.err (!%p297_p3)
}
 0x120   :  { %s301_s0 = scalar_lea.hbm %s186_s28, 128  ;;  %s303_s5 = scalar_lea.hbm %s396_s4, 128 }
 0x121   :  { %p302_p4 = scmp.ne.s32.totalorder %s186_s28, %s301_s0  ;;  %p304_p5 = scmp.lt.s32.totalorder %s186_s28, %s396_s4 }
 0x122   :  { %p305_p6 = scmp.lt.s32.totalorder %s303_s5, %s301_s0 }
 0x124   :  { %p306_p7 = por %p305_p6, %p304_p5 }
 0x126   :  { %p307_p8 = pnand %p306_p7, %p302_p4 }
 0x128   :  { %310 = shalt.err (!%p307_p8)
}
 0x129   :  { %191 = dma.vmem_to_hbm [thread:$0]  %s189_s24, 128, %s186_s28, [#allocation8]  }
 0x12a   :  { %313 = dma.done.wait [#allocation8], 128  }
 0x12b   :  { %314 = vsyncadd [#allocation8], 4294967168 }
 0x12c   :  { %195 = vsyncpa [#allocation7], 1 }
 0x12d   :  { %196 = vsyncpa [#allocation8], 1 }

</bundles_post_ra>
